<compile_context>
chip_gen: v6e
topology: v6e:2x2x1
jax: 0.10.0
libtpu: 0.0.40
codegen_flags: <defaults>
</compile_context>

<pallas_src>
import jax
import jax.numpy as jnp
from jax.experimental import pallas as pl
from jax.experimental.pallas import tpu as pltpu

NUM_STEPS = 2
BETA = 1.0
THRESHOLD = 1.0
LANE = 128        # batch minor tile (lane axis)
TR_MAX = 512      # max rows (sublane axis) per grid step -> ~512 KiB / input block


def _round_up(x, m):
    return ((x + m - 1) // m) * m


def net1_kernel(x_ref, w_ref, b_ref, spk_ref, mem_ref):
    # x_ref  : (2, TR, 128) VMEM — feature plane 0/1, batch on (sublane, lane)
    # w_ref  : (2,) SMEM — fc1 weight (flattened)
    # b_ref  : (1,) SMEM — fc1 bias
    # spk_ref: (NUM_STEPS, TR, 128) VMEM
    # mem_ref: (NUM_STEPS, TR, 128) VMEM
    x0 = x_ref[0]                       # (TR, 128) dense plane
    x1 = x_ref[1]                       # (TR, 128) dense plane
    w0 = w_ref[0]
    w1 = w_ref[1]
    b0 = b_ref[0]

    # fc1: cur = w0*x0 + w1*x1 + b  (pure VPU FMAs on dense 8x128 vregs)
    cur = w0 * x0 + w1 * x1 + b0        # (TR, 128)

    # lif1.init_leaky()
    mem = jnp.zeros_like(cur)

    # num_steps is small & static -> unrolled; full-block unmasked stores.
    for step in range(NUM_STEPS):
        reset = (mem > THRESHOLD).astype(cur.dtype)      # uses mem BEFORE update
        mem = BETA * mem + cur - reset * THRESHOLD       # reset-by-subtraction
        spk = (mem > THRESHOLD).astype(cur.dtype)        # heaviside fire
        spk_ref[step] = spk
        mem_ref[step] = mem


def net1_forward(x, w, b):
    """x: (B, 2) f32, w: (1, 2) f32, b: (1,) f32 -> (spk, mem) each (NUM_STEPS, B, 1)."""
    B = x.shape[0]

    # Tiling: batch -> (R, 128); rows tiled into num_tiles balanced blocks of TR
    # rows (TR a multiple of 8, <= ~TR_MAX) to minimize padding.
    r_raw = pl.cdiv(B, LANE)
    num_tiles = pl.cdiv(_round_up(r_raw, 8), TR_MAX)
    tr = _round_up(pl.cdiv(r_raw, num_tiles), 8)
    r_pad = num_tiles * tr
    b_pad = r_pad * LANE

    # Layout plumbing: features on the leading axis, batch dense on (R, 128).
    # (Small one-time pass over 8*B input bytes; outputs need no such pass.)
    x_t = jnp.pad(x.astype(jnp.float32).T, ((0, 0), (0, b_pad - B)))   # (2, B_pad)
    x_t = x_t.reshape(2, r_pad, LANE)                                   # (2, R, 128)
    w_flat = w.reshape(2).astype(jnp.float32)                           # (2,)
    b_flat = b.reshape(1).astype(jnp.float32)                           # (1,)

    spk_out, mem_out = pl.pallas_call(
        net1_kernel,
        out_shape=(
            jax.ShapeDtypeStruct((NUM_STEPS, r_pad, LANE), jnp.float32),
            jax.ShapeDtypeStruct((NUM_STEPS, r_pad, LANE), jnp.float32),
        ),
        grid=(num_tiles,),
        in_specs=[
            pl.BlockSpec((2, tr, LANE), lambda i: (0, i, 0)),          # x block (VMEM)
            pl.BlockSpec(memory_space=pltpu.MemorySpace.SMEM),         # w scalars
            pl.BlockSpec(memory_space=pltpu.MemorySpace.SMEM),         # b scalar
        ],
        out_specs=(
            pl.BlockSpec((NUM_STEPS, tr, LANE), lambda i: (0, i, 0)),  # spk block
            pl.BlockSpec((NUM_STEPS, tr, LANE), lambda i: (0, i, 0)),  # mem block
        ),
        compiler_params=pltpu.CompilerParams(
            dimension_semantics=("parallel",),
        ),
    )(x_t, w_flat, b_flat)

    # Metadata-only reshape; the :B slice is a no-op when B is already a
    # multiple of the tile footprint.
    spk_rec = spk_out.reshape(NUM_STEPS, b_pad)[:, :B][..., None]      # (NUM_STEPS, B, 1)
    mem_rec = mem_out.reshape(NUM_STEPS, b_pad)[:, :B][..., None]      # (NUM_STEPS, B, 1)
    return spk_rec, mem_rec


if __name__ == "__main__":
    key = jax.random.PRNGKey(0)
    kx, kw, kb = jax.random.split(key, 3)

    B = 8
    x = jax.random.normal(kx, (B, 2), dtype=jnp.float32)

    # fc1.weight.data.uniform_(-1, 3)
    w = jax.random.uniform(kw, (1, 2), minval=-1.0, maxval=3.0, dtype=jnp.float32)
    # nn.Linear default bias init: U(-1/sqrt(fan_in), 1/sqrt(fan_in)), fan_in=2
    bound = float(1.0 / jnp.sqrt(2.0))
    b = jax.random.uniform(kb, (1,), minval=-bound, maxval=bound, dtype=jnp.float32)

    spk_rec, mem_rec = net1_forward(x, w, b)
    jax.block_until_ready((spk_rec, mem_rec))

    # Pure-JAX reference of the PyTorch forward (same scalar-FMA order as the
    # kernel so the strict '>' threshold comparison is not ulp-flaky).
    cur = x[:, 0:1] * w[0, 0] + x[:, 1:2] * w[0, 1] + b[0]             # (B, 1)
    mem = jnp.zeros_like(cur)
    spk_list, mem_list = [], []
    for _ in range(NUM_STEPS):
        reset = (mem > THRESHOLD).astype(jnp.float32)
        mem = BETA * mem + cur - reset * THRESHOLD
        spk = (mem > THRESHOLD).astype(jnp.float32)
        spk_list.append(spk)
        mem_list.append(mem)
    ref_spk = jnp.stack(spk_list, axis=0)
    ref_mem = jnp.stack(mem_list, axis=0)

    assert spk_rec.shape == (NUM_STEPS, B, 1) and mem_rec.shape == (NUM_STEPS, B, 1)
    assert jnp.allclose(spk_rec, ref_spk), "spike mismatch"
    assert jnp.allclose(mem_rec, ref_mem, atol=1e-6), "membrane mismatch"

    print("KERNEL_OK")
</pallas_src>

<mosaic_0001>
module attributes {stable_mosaic.version = 11 : i64} {
  func.func @net1_kernel(%arg0: i32, %arg1: memref<2x8x128xf32, #tpu.memory_space<vmem>>, %arg2: memref<2xf32, #tpu.memory_space<smem>>, %arg3: memref<1xf32, #tpu.memory_space<smem>>, %arg4: memref<2x8x128xf32, #tpu.memory_space<vmem>>, %arg5: memref<2x8x128xf32, #tpu.memory_space<vmem>>) attributes {dimension_semantics = [#tpu.dimension_semantics<parallel>], iteration_bounds = array<i64: 1>, scalar_prefetch = 0 : i64, scratch_operands = 0 : i64, tpu.core_type = #tpu.core_type<tc>, window_params = [{transform_indices = @transform_0, window_bounds = array<i64: 2, 8, 128>}, {transform_indices = @transform_1, window_bounds = array<i64: 2>}, {transform_indices = @transform_2, window_bounds = array<i64: 1>}, {transform_indices = @transform_3, window_bounds = array<i64: 2, 8, 128>}, {transform_indices = @transform_4, window_bounds = array<i64: 2, 8, 128>}]} {
    %c0 = arith.constant 0 : index
    %c0_0 = arith.constant 0 : index
    %c0_1 = arith.constant 0 : index
    %0 = vector.load %arg1[%c0, %c0_0, %c0_1] : memref<2x8x128xf32, #tpu.memory_space<vmem>>, vector<1x8x128xf32>
    %1 = vector.shape_cast %0 : vector<1x8x128xf32> to vector<8x128xf32>
    %c1 = arith.constant 1 : index
    %c0_2 = arith.constant 0 : index
    %c0_3 = arith.constant 0 : index
    %2 = vector.load %arg1[%c1, %c0_2, %c0_3] : memref<2x8x128xf32, #tpu.memory_space<vmem>>, vector<1x8x128xf32>
    %3 = vector.shape_cast %2 : vector<1x8x128xf32> to vector<8x128xf32>
    %c0_4 = arith.constant 0 : index
    %4 = memref.load %arg2[%c0_4] : memref<2xf32, #tpu.memory_space<smem>>
    %c1_5 = arith.constant 1 : index
    %5 = memref.load %arg2[%c1_5] : memref<2xf32, #tpu.memory_space<smem>>
    %c0_6 = arith.constant 0 : index
    %6 = memref.load %arg3[%c0_6] : memref<1xf32, #tpu.memory_space<smem>>
    %7 = vector.broadcast %4 : f32 to vector<8x128xf32>
    %8 = arith.mulf %7, %1 : vector<8x128xf32>
    %9 = vector.broadcast %5 : f32 to vector<8x128xf32>
    %10 = arith.mulf %9, %3 : vector<8x128xf32>
    %11 = arith.addf %8, %10 : vector<8x128xf32>
    %12 = vector.broadcast %6 : f32 to vector<8x128xf32>
    %13 = arith.addf %11, %12 : vector<8x128xf32>
    %cst = arith.constant 0.000000e+00 : f32
    %14 = vector.broadcast %cst : f32 to vector<8x128xf32>
    %cst_7 = arith.constant 1.000000e+00 : f32
    %15 = vector.broadcast %cst_7 : f32 to vector<8x128xf32>
    %16 = arith.cmpf ogt, %14, %15 : vector<8x128xf32>
    %17 = arith.extui %16 : vector<8x128xi1> to vector<8x128xi32>
    %18 = arith.sitofp %17 : vector<8x128xi32> to vector<8x128xf32>
    %cst_8 = arith.constant 1.000000e+00 : f32
    %19 = vector.broadcast %cst_8 : f32 to vector<8x128xf32>
    %20 = arith.mulf %19, %14 : vector<8x128xf32>
    %21 = arith.addf %20, %13 : vector<8x128xf32>
    %cst_9 = arith.constant 1.000000e+00 : f32
    %22 = vector.broadcast %cst_9 : f32 to vector<8x128xf32>
    %23 = arith.mulf %18, %22 : vector<8x128xf32>
    %24 = arith.subf %21, %23 : vector<8x128xf32>
    %cst_10 = arith.constant 1.000000e+00 : f32
    %25 = vector.broadcast %cst_10 : f32 to vector<8x128xf32>
    %26 = arith.cmpf ogt, %24, %25 : vector<8x128xf32>
    %27 = arith.extui %26 : vector<8x128xi1> to vector<8x128xi32>
    %28 = arith.sitofp %27 : vector<8x128xi32> to vector<8x128xf32>
    %c0_11 = arith.constant 0 : index
    %c0_12 = arith.constant 0 : index
    %c0_13 = arith.constant 0 : index
    %29 = vector.load %arg4[%c0_11, %c0_12, %c0_13] : memref<2x8x128xf32, #tpu.memory_space<vmem>>, vector<1x8x128xf32>
    %30 = vector.shape_cast %29 : vector<1x8x128xf32> to vector<8x128xf32>
    %31 = vector.shape_cast %28 : vector<8x128xf32> to vector<1x8x128xf32>
    tpu.vector_store %arg4[%c0_11, %c0_12, %c0_13], %31 {strides = array<i32>} : memref<2x8x128xf32, #tpu.memory_space<vmem>>, vector<1x8x128xf32>,
    %c0_14 = arith.constant 0 : index
    %c0_15 = arith.constant 0 : index
    %c0_16 = arith.constant 0 : index
    %32 = vector.load %arg5[%c0_14, %c0_15, %c0_16] : memref<2x8x128xf32, #tpu.memory_space<vmem>>, vector<1x8x128xf32>
    %33 = vector.shape_cast %32 : vector<1x8x128xf32> to vector<8x128xf32>
    %34 = vector.shape_cast %24 : vector<8x128xf32> to vector<1x8x128xf32>
    tpu.vector_store %arg5[%c0_14, %c0_15, %c0_16], %34 {strides = array<i32>} : memref<2x8x128xf32, #tpu.memory_space<vmem>>, vector<1x8x128xf32>,
    %cst_17 = arith.constant 1.000000e+00 : f32
    %35 = vector.broadcast %cst_17 : f32 to vector<8x128xf32>
    %36 = arith.cmpf ogt, %24, %35 : vector<8x128xf32>
    %37 = arith.extui %36 : vector<8x128xi1> to vector<8x128xi32>
    %38 = arith.sitofp %37 : vector<8x128xi32> to vector<8x128xf32>
    %cst_18 = arith.constant 1.000000e+00 : f32
    %39 = vector.broadcast %cst_18 : f32 to vector<8x128xf32>
    %40 = arith.mulf %39, %24 : vector<8x128xf32>
    %41 = arith.addf %40, %13 : vector<8x128xf32>
    %cst_19 = arith.constant 1.000000e+00 : f32
    %42 = vector.broadcast %cst_19 : f32 to vector<8x128xf32>
    %43 = arith.mulf %38, %42 : vector<8x128xf32>
    %44 = arith.subf %41, %43 : vector<8x128xf32>
    %cst_20 = arith.constant 1.000000e+00 : f32
    %45 = vector.broadcast %cst_20 : f32 to vector<8x128xf32>
    %46 = arith.cmpf ogt, %44, %45 : vector<8x128xf32>
    %47 = arith.extui %46 : vector<8x128xi1> to vector<8x128xi32>
    %48 = arith.sitofp %47 : vector<8x128xi32> to vector<8x128xf32>
    %c1_21 = arith.constant 1 : index
    %c0_22 = arith.constant 0 : index
    %c0_23 = arith.constant 0 : index
    %49 = vector.load %arg4[%c1_21, %c0_22, %c0_23] : memref<2x8x128xf32, #tpu.memory_space<vmem>>, vector<1x8x128xf32>
    %50 = vector.shape_cast %49 : vector<1x8x128xf32> to vector<8x128xf32>
    %51 = vector.shape_cast %48 : vector<8x128xf32> to vector<1x8x128xf32>
    tpu.vector_store %arg4[%c1_21, %c0_22, %c0_23], %51 {strides = array<i32>} : memref<2x8x128xf32, #tpu.memory_space<vmem>>, vector<1x8x128xf32>,
    %c1_24 = arith.constant 1 : index
    %c0_25 = arith.constant 0 : index
    %c0_26 = arith.constant 0 : index
    %52 = vector.load %arg5[%c1_24, %c0_25, %c0_26] : memref<2x8x128xf32, #tpu.memory_space<vmem>>, vector<1x8x128xf32>
    %53 = vector.shape_cast %52 : vector<1x8x128xf32> to vector<8x128xf32>
    %54 = vector.shape_cast %44 : vector<8x128xf32> to vector<1x8x128xf32>
    tpu.vector_store %arg5[%c1_24, %c0_25, %c0_26], %54 {strides = array<i32>} : memref<2x8x128xf32, #tpu.memory_space<vmem>>, vector<1x8x128xf32>,
    return
  }
  func.func @transform_0(%arg0: i32) -> (i32, i32, i32) {
    %c0_i32 = arith.constant 0 : i32
    %c0_i32_0 = arith.constant 0 : i32
    %c0_i32_1 = arith.constant 0 : i32
    return %c0_i32, %arg0, %c0_i32_0 : i32, i32, i32
  }
  func.func @transform_1(%arg0: i32) -> i32 {
    %c0_i32 = arith.constant 0 : i32
    %c0_i32_0 = arith.constant 0 : i32
    return %c0_i32 : i32
  }
  func.func @transform_2(%arg0: i32) -> i32 {
    %c0_i32 = arith.constant 0 : i32
    %c0_i32_0 = arith.constant 0 : i32
    return %c0_i32 : i32
  }
  func.func @transform_3(%arg0: i32) -> (i32, i32, i32) {
    %c0_i32 = arith.constant 0 : i32
    %c0_i32_0 = arith.constant 0 : i32
    %c0_i32_1 = arith.constant 0 : i32
    return %c0_i32, %arg0, %c0_i32_0 : i32, i32, i32
  }
  func.func @transform_4(%arg0: i32) -> (i32, i32, i32) {
    %c0_i32 = arith.constant 0 : i32
    %c0_i32_0 = arith.constant 0 : i32
    %c0_i32_1 = arith.constant 0 : i32
    return %c0_i32, %arg0, %c0_i32_0 : i32, i32, i32
  }
}

</mosaic_0001>

<bundles_post_ra>
// kernel: tpu_custom_call.1
= control target key start
LH: loop header
LB: loop body
LE: loop exit
PB: predicated region body
PF: predicated region fallthrough
CT: control target
= control target key end

     0   :  { %11 = vsyncpa [#allocation4], 0  ;;  %s258_s0 = inlined_call_operand.hbm [shape: f32[2,8,128], index: 0, kind: input, shape index: {}]   ;;  %s259_s1 = inlined_call_operand.vmem [shape: f32[2], index: 1, kind: input, shape index: {}]   ;;  %s260_s2 = inlined_call_operand.<no memory space> [shape: f32[1], index: 2, kind: input, shape index: {}]   ;;  %s261_s3 = inlined_call_operand.hbm [shape: f32[2,8,128], index: 3, kind: output, shape index: {0}]   ;;  %s262_s4 = inlined_call_operand.hbm [shape: f32[2,8,128], index: 4, kind: output, shape index: {1}]  }
   0x1   :  { %12 = vsyncpa [#allocation6], 0 }
   0x2   :  { %13 = vsyncpa [#allocation5], 0 }
   0x3   :  { %14 = vsyncpa [#allocation10], 0  ;;  %s202_s15 = smov [#allocation3]   ;;  %s33_s19 = sshll.u32 %s259_s1, 4  ;;  %s34_s19 = int_to_ptr.vmem [resolvable:$true] %s33_s19 }
   0x4   :  { %s20_s16 = sshll.u32 %s202_s15, 4  ;;  %s21_s16 = int_to_ptr.vmem [resolvable:$true] %s20_s16 }
   0x5   :  { %s130_s20 = scalar_lea.vmem %s21_s16, 256  ;;  %p135_p1 = scmp.lt.s32.totalorder %s21_s16, %s21_s16 }
   0x6   :  { %p131_p0 = scmp.ne.s32.totalorder %s21_s16, %s130_s20  ;;  %p136_p2 = scmp.lt.s32.totalorder %s130_s20, %s130_s20 }
   0x8   :  { %p137_p3 = por %p136_p2, %p135_p1 }
   0xa   :  { %p138_p4 = pnand %p137_p3, %p131_p0 }
   0xc   :  { %141 = shalt.err (!%p138_p4)
}
   0xd   :  { %s203_s21 = smov 128   ;;  %s204_s22 = smov 8  }
   0xe   :  { %26 = dma.hbm_to_vmem [thread:$0]  %s258_s0, 256, %s21_s16, [#allocation4], %s203_s21, %s203_s21, %s204_s22  }
   0xf   :  { %s142_s25 = scalar_lea.vmem %s34_s19, 16  ;;  %p147_p6 = scmp.lt.s32.totalorder %s34_s19, %s34_s19 }
  0x10   :  { %p143_p5 = scmp.ne.s32.totalorder %s34_s19, %s142_s25  ;;  %p148_p7 = scmp.lt.s32.totalorder %s142_s25, %s142_s25 }
  0x12   :  { %p149_p8 = por %p148_p7, %p147_p6 }
  0x14   :  { %p150_p9 = pnand %p149_p8, %p143_p5 }
  0x16   :  { %153 = shalt.err (!%p150_p9)
}
  0x17   :  { %s205_s1 = smov [#allocation7]  }
  0x18   :  { %36 = dma.vmem_to_smem %s34_s19, 16, %s205_s1, [#allocation6]  }
  0x19   :  { %194 = dma.done.wait [#allocation4], 256  }
  0x1a   :  { %195 = vsyncadd [#allocation4], 4294967040 }
  0x1b   :  { %196 = dma.done.wait [#allocation6], 16  }
  0x1c   :  { %197 = vsyncadd [#allocation6], 4294967280 }
  0x1d   :  { %45 = sfence }
  0x1e   :  { %s49_s26 = sld [smem:[#allocation7]]  ;;  %v46_v0 = vld [vmem:[#allocation3] sm:$0xff]  ;;  %v48_v1 = vld [vmem:[#allocation3 + $0x8] sm:$0xff]  ;;  %v57_v6 = vstv %s260_s2  ;;  %s206_s29 = smov [#allocation9]   ;;  %v207_v10 = vmov 0.0  }
  0x1f   :  { %s112_s27 = sld [smem:[#allocation7 + $0x1]]  ;;  %s95_s30 = sshll.u32 %s206_s29, 4  ;;  %s96_s30 = int_to_ptr.vmem [resolvable:$true] %s95_s30 }
  0x20   :  { %s208_s5 = smov [#allocation8]   ;;  %s154_s7 = scalar_lea.vmem %s96_s30, 256 }
  0x21   :  { %s83_s6 = sshll.u32 %s208_s5, 4  ;;  %p155_p10 = scmp.ne.s32.totalorder %s96_s30, %s154_s7  ;;  %s84_s6 = int_to_ptr.vmem [resolvable:$true] %s83_s6 }
  0x22   :  { %p159_p11 = scmp.lt.s32.totalorder %s96_s30, %s96_s30  ;;  %p160_p12 = scmp.lt.s32.totalorder %s154_s7, %s154_s7 }
  0x24   :  { %v52_v2 = vstv %s49_s26  ;;  %p161_p13 = por %p160_p12, %p159_p11 }
  0x25   :  { %v53_v3 = vmul.f32 %v52_v2, %v46_v0  ;;  %v54_v4 = vstv %s112_s27 }
  0x26   :  { %v55_v5 = vmul.f32 %v54_v4, %v48_v1  ;;  %p162_p0 = pnand %p161_p13, %p155_p10 }
  0x28   :  { %v56_v7 = vadd.f32 %v55_v5, %v53_v3 }
  0x2a   :  { %v58_v8 = vadd.f32 %v57_v6, %v56_v7 }
  0x2c   :  { %vm64_vm0 = vcmp.gt.f32.partialorder %v58_v8, 1.0  ;;  %v69_v9 = vadd.f32 %v58_v8, %v58_v8  ;;  %68 = vst [vmem:[#allocation9] sm:$0xff] %v58_v8 }
  0x2d   :  { %v113_v11 = vsel %vm64_vm0, 1.0, %v207_v10 }
  0x2e   :  { %67 = vst [vmem:[#allocation8] sm:$0xff] %v113_v11  ;;  %v70_v12 = vsub.f32 %v69_v9, %v113_v11 }
  0x30   :  { %77 = vst [vmem:[#allocation9 + $0x8] sm:$0xff] %v70_v12  ;;  %vm71_vm1 = vcmp.gt.f32.partialorder %v70_v12, 1.0 }
  0x31   :  { %v114_v13 = vsel %vm71_vm1, 1.0, %v207_v10 }
  0x32   :  { %165 = shalt.err (!%p162_p0)
}
  0x33   :  { %101 = dma.vmem_to_hbm [thread:$0]  %s96_s30, 256, %s262_s4, [#allocation10], %s203_s21, %s203_s21, %s204_s22   ;;  %75 = vst [vmem:[#allocation8 + $0x8] sm:$0xff] %v114_v13 }
  0x34   :  { %s174_s9 = scalar_lea.vmem %s84_s6, 256  ;;  %p179_p2 = scmp.lt.s32.totalorder %s84_s6, %s84_s6 }
  0x35   :  { %p175_p1 = scmp.ne.s32.totalorder %s84_s6, %s174_s9  ;;  %p180_p3 = scmp.lt.s32.totalorder %s174_s9, %s174_s9 }
  0x37   :  { %p181_p4 = por %p180_p3, %p179_p2 }
  0x39   :  { %p182_p5 = pnand %p181_p4, %p175_p1 }
  0x3b   :  { %185 = shalt.err (!%p182_p5)
}
  0x3c   :  { %89 = dma.vmem_to_hbm [thread:$0]  %s84_s6, 256, %s261_s3, [#allocation5], %s203_s21, %s203_s21, %s204_s22  }
  0x3d   :  { %198 = dma.done.wait [#allocation5], 256  }
  0x3e   :  { %199 = vsyncadd [#allocation5], 4294967040 }
  0x3f   :  { %200 = dma.done.wait [#allocation10], 256  }
  0x40   :  { %201 = vsyncadd [#allocation10], 4294967040 }
  0x41   :  { %108 = vsyncpa [#allocation4], 1 }
  0x42   :  { %109 = vsyncpa [#allocation5], 1 }
  0x43   :  { %110 = vsyncpa [#allocation10], 1 }
  0x44   :  { %111 = vsyncpa [#allocation6], 1 }

</bundles_post_ra>
